<compile_context>
chip_gen: v6e
topology: v6e:2x2x1
jax: 0.10.0
libtpu: 0.0.40
codegen_flags: <defaults>
</compile_context>

<pallas_src>
import jax
import jax.numpy as jnp
import numpy as np
from jax.experimental import pallas as pl
from jax.experimental.pallas import tpu as pltpu


def _round_up(x, m):
    return ((x + m - 1) // m) * m


def _pick_tile_m(n_rows, cap=512):
    """Row-tile size: multiple of 128, at most `cap`, aiming for >=2 grid
    steps (v7x megacore) when N is large enough."""
    half = _round_up(max(1, (n_rows + 1) // 2), 128)
    return int(max(128, min(cap, half)))


# ----------------------------- Pallas kernels -------------------------------

def _mlp_l2norm_kernel(x_ref, w1_ref, b1_ref, w2_ref, b2_ref, o_ref):
    """One row tile: y = L2Norm(ReLU(x@W1 + b1) @ W2 + b2).

    x / W1 / W2 are bf16 (MXU-native rate, f32 accumulation); bias adds, ReLU
    and the L2 normalization are done in f32.
    """
    h = jnp.dot(x_ref[...], w1_ref[...], preferred_element_type=jnp.float32)
    h = jnp.maximum(h + b1_ref[...], 0.0)                     # f32 [TM, nc]
    y = jnp.dot(h.astype(w2_ref.dtype), w2_ref[...],
                preferred_element_type=jnp.float32)
    y = y + b2_ref[...]                                       # f32 [TM, nc]
    # Normalize(power=2): y / (sqrt(sum(y^2, -1)) + 1e-7); divide on the EUP.
    norm = jnp.sqrt(jnp.sum(y * y, axis=-1, keepdims=True))
    o_ref[...] = (y * pl.reciprocal(norm + 1e-7, approx=True)).astype(o_ref.dtype)


def _l2norm_kernel(x_ref, o_ref):
    """L2 norm over the channel (last) dim only (use_mlp=False path)."""
    x = x_ref[...]
    if x.dtype != jnp.float32:                                # static; no-op for f32
        x = x.astype(jnp.float32)
    norm = jnp.sqrt(jnp.sum(x * x, axis=-1, keepdims=True))
    o_ref[...] = (x * pl.reciprocal(norm + 1e-7, approx=True)).astype(o_ref.dtype)


# ------------------------------- wrappers ------------------------------------

def mlp_l2norm(x, w1, b1, w2, b2, *, tile_m=None, out_dtype=jnp.float32):
    """x: [N, C]; w1: [C, nc] bf16; b1: [1, nc] f32; w2: [nc, nc] bf16; b2: [1, nc]."""
    N, C = x.shape
    nc = w1.shape[1]
    if x.dtype != jnp.bfloat16:
        x = x.astype(jnp.bfloat16)
    if tile_m is None:
        tile_m = _pick_tile_m(N)
    n_pad = _round_up(N, tile_m)
    if n_pad != N:
        x = jnp.pad(x, ((0, n_pad - N), (0, 0)))
    grid = (n_pad // tile_m,)
    out = pl.pallas_call(
        _mlp_l2norm_kernel,
        out_shape=jax.ShapeDtypeStruct((n_pad, nc), out_dtype),
        grid_spec=pltpu.PrefetchScalarGridSpec(
            num_scalar_prefetch=0,
            grid=grid,
            in_specs=[
                pl.BlockSpec((tile_m, C), lambda i: (i, 0)),   # x row tile (bf16)
                pl.BlockSpec((C, nc), lambda i: (0, 0)),       # W1 (full, bf16)
                pl.BlockSpec((1, nc), lambda i: (0, 0)),       # b1 (f32)
                pl.BlockSpec((nc, nc), lambda i: (0, 0)),      # W2 (full, bf16)
                pl.BlockSpec((1, nc), lambda i: (0, 0)),       # b2 (f32)
            ],
            out_specs=pl.BlockSpec((tile_m, nc), lambda i: (i, 0)),
        ),
        compiler_params=pltpu.CompilerParams(
            dimension_semantics=("parallel",)),
    )(x, w1, b1, w2, b2)
    return out[:N] if n_pad != N else out


def l2norm_only(x, *, tile_m=None):
    N, C = x.shape
    if tile_m is None:
        tile_m = _pick_tile_m(N)
    n_pad = _round_up(N, tile_m)
    if n_pad != N:
        x = jnp.pad(x, ((0, n_pad - N), (0, 0)))
    grid = (n_pad // tile_m,)
    out = pl.pallas_call(
        _l2norm_kernel,
        out_shape=jax.ShapeDtypeStruct((n_pad, C), x.dtype),
        grid_spec=pltpu.PrefetchScalarGridSpec(
            num_scalar_prefetch=0,
            grid=grid,
            in_specs=[pl.BlockSpec((tile_m, C), lambda i: (i, 0))],
            out_specs=pl.BlockSpec((tile_m, C), lambda i: (i, 0)),
        ),
        compiler_params=pltpu.CompilerParams(
            dimension_semantics=("parallel",)),
    )(x)
    return out[:N] if n_pad != N else out


# ----------------------------- module wrapper --------------------------------

class PatchSampleF:
    """JAX/Pallas port of PatchSampleF (forward pass only)."""

    def __init__(self, use_mlp=False, init_gain=0.02, nc=256, seed=0):
        self.use_mlp = use_mlp
        self.init_gain = init_gain
        self.nc = nc
        self.mlp_init = False
        self.mlps = []          # list of (w1_bf16, b1_f32, w2_bf16, b2_f32)
        self._seed = seed

    def _create_mlp(self, feats):
        # init_weights(init_type='normal'): weights ~ N(0, init_gain), bias = 0.
        key = jax.random.PRNGKey(self._seed)
        self.mlps = []
        for feat in feats:
            input_nc = feat.shape[1]                      # NCHW -> C
            key, k1, k2 = jax.random.split(key, 3)
            # Stored as [in, out] (transpose of torch Linear weight), bf16 for MXU.
            w1 = (jax.random.normal(k1, (input_nc, self.nc), jnp.float32)
                  * self.init_gain).astype(jnp.bfloat16)
            b1 = jnp.zeros((1, self.nc), jnp.float32)
            w2 = (jax.random.normal(k2, (self.nc, self.nc), jnp.float32)
                  * self.init_gain).astype(jnp.bfloat16)
            b2 = jnp.zeros((1, self.nc), jnp.float32)
            self.mlps.append((w1, b1, w2, b2))
        self.mlp_init = True

    def __call__(self, feats, num_patches=64, patch_ids=None, rng_key=None):
        return_ids, return_feats = [], []
        if self.use_mlp and not self.mlp_init:
            self._create_mlp(feats)
        if rng_key is None:
            rng_key = jax.random.PRNGKey(1234)
        for feat_id, feat in enumerate(feats):
            B, C, H, W = feat.shape
            if num_patches > 0:
                if patch_ids is not None:
                    patch_id = jnp.asarray(patch_ids[feat_id], dtype=jnp.int32)
                else:
                    # deterministic stand-in for np.random.permutation
                    rng_key, sub = jax.random.split(rng_key)
                    patch_id = jax.random.permutation(sub, H * W)
                    patch_id = patch_id[: int(min(num_patches, H * W))]
                    patch_id = patch_id.astype(jnp.int32)
                # Gather along the flattened spatial axis of NCHW, then
                # transpose only the small gathered result (avoids writing a
                # full transposed copy of the feature map to HBM).
                feat_flat = feat.reshape(B, C, H * W)
                x_g = jnp.take(feat_flat, patch_id, axis=2)          # [B, C, P]
                x_sample = jnp.transpose(x_g, (0, 2, 1)).reshape(-1, C)
            else:
                x_sample = jnp.transpose(feat, (0, 2, 3, 1)).reshape(-1, C)
                patch_id = jnp.asarray([], dtype=jnp.int32)

            if self.use_mlp:
                w1, b1, w2, b2 = self.mlps[feat_id]
                x_sample = mlp_l2norm(x_sample, w1, b1, w2, b2)
            else:
                x_sample = l2norm_only(x_sample)

            return_ids.append(patch_id)
            if num_patches == 0:
                # back to [B, C_out, H, W]
                c_out = x_sample.shape[-1]
                x_sample = x_sample.reshape(B, H * W, c_out)
                x_sample = jnp.transpose(x_sample, (0, 2, 1)).reshape(B, c_out, H, W)
            return_feats.append(x_sample)
        return return_feats, return_ids


# ------------------------------ references -----------------------------------

def _ref_mlp_l2norm(x, w1_bf, b1, w2_bf, b2):
    """Pure-JAX reference using the same bf16 matmul operands / f32 accumulate."""
    x = x.astype(jnp.bfloat16)
    h = jnp.dot(x, w1_bf, preferred_element_type=jnp.float32) + b1
    h = jnp.maximum(h, 0.0)
    y = jnp.dot(h.astype(jnp.bfloat16), w2_bf,
                preferred_element_type=jnp.float32) + b2
    norm = jnp.sqrt(jnp.sum(y * y, axis=-1, keepdims=True))
    return y / (norm + 1e-7)


def _ref_l2norm(x):
    norm = jnp.sqrt(jnp.sum(x * x, axis=-1, keepdims=True))
    return x / (norm + 1e-7)


def _gather_ref(feat, patch_id):
    B, C, H, W = feat.shape
    fr = jnp.transpose(feat, (0, 2, 3, 1)).reshape(B, H * W, C)
    return jnp.take(fr, patch_id, axis=1).reshape(-1, C)


if __name__ == "__main__":
    key = jax.random.PRNGKey(0)
    k1, k2 = jax.random.split(key)

    # Two feature maps (the module takes a list of feats), NCHW, small shapes.
    feat0 = jax.random.normal(k1, (2, 4, 16, 16), jnp.float32)
    feat1 = jax.random.normal(k2, (2, 8, 8, 8), jnp.float32)
    feats = [feat0, feat1]

    ok = True

    # --- use_mlp=True path (Linear -> ReLU -> Linear -> L2 norm) ---
    model = PatchSampleF(use_mlp=True, init_gain=0.02, nc=256, seed=0)
    out_feats, out_ids = model(feats, num_patches=64)
    out_feats = [jax.block_until_ready(f) for f in out_feats]

    for fid, feat in enumerate(feats):
        xs = _gather_ref(feat, out_ids[fid])
        w1, b1, w2, b2 = model.mlps[fid]
        ref = _ref_mlp_l2norm(xs, w1, b1, w2, b2)
        if not np.allclose(np.asarray(out_feats[fid]), np.asarray(ref),
                           rtol=1e-2, atol=1e-2):
            ok = False

    # --- use_mlp=False path (L2 norm only) ---
    model_nomlp = PatchSampleF(use_mlp=False)
    out_feats2, out_ids2 = model_nomlp(feats, num_patches=64)
    out_feats2 = [jax.block_until_ready(f) for f in out_feats2]

    for fid, feat in enumerate(feats):
        xs = _gather_ref(feat, out_ids2[fid])
        ref = _ref_l2norm(xs)
        if not np.allclose(np.asarray(out_feats2[fid]), np.asarray(ref),
                           rtol=1e-2, atol=1e-2):
            ok = False

    print("KERNEL_OK" if ok else "MISMATCH")
</pallas_src>

<mosaic_0001>
module attributes {stable_mosaic.version = 11 : i64} {
  func.func @_mlp_l2norm_kernel(%arg0: i32, %arg1: memref<128x4xbf16, #tpu.memory_space<vmem>>, %arg2: memref<4x256xbf16, #tpu.memory_space<vmem>>, %arg3: memref<1x256xf32, #tpu.memory_space<vmem>>, %arg4: memref<256x256xbf16, #tpu.memory_space<vmem>>, %arg5: memref<1x256xf32, #tpu.memory_space<vmem>>, %arg6: memref<128x256xf32, #tpu.memory_space<vmem>>) attributes {dimension_semantics = [#tpu.dimension_semantics<parallel>], iteration_bounds = array<i64: 1>, scalar_prefetch = 0 : i64, scratch_operands = 0 : i64, tpu.core_type = #tpu.core_type<tc>, window_params = [{transform_indices = @transform_0, window_bounds = array<i64: 128, 4>}, {pipeline_mode = #tpu.pipeline_mode<synchronous>, transform_indices = @transform_1, window_bounds = array<i64: 4, 256>}, {pipeline_mode = #tpu.pipeline_mode<synchronous>, transform_indices = @transform_2, window_bounds = array<i64: 1, 256>}, {pipeline_mode = #tpu.pipeline_mode<synchronous>, transform_indices = @transform_3, window_bounds = array<i64: 256, 256>}, {pipeline_mode = #tpu.pipeline_mode<synchronous>, transform_indices = @transform_4, window_bounds = array<i64: 1, 256>}, {transform_indices = @transform_5, window_bounds = array<i64: 128, 256>}]} {
    %c0 = arith.constant 0 : index
    %c0_0 = arith.constant 0 : index
    %0 = vector.load %arg1[%c0, %c0_0] : memref<128x4xbf16, #tpu.memory_space<vmem>>, vector<128x4xbf16>
    %c0_1 = arith.constant 0 : index
    %c0_2 = arith.constant 0 : index
    %1 = vector.load %arg2[%c0_1, %c0_2] : memref<4x256xbf16, #tpu.memory_space<vmem>>, vector<4x256xbf16>
    %cst = arith.constant dense<0.000000e+00> : vector<128x256xf32>
    %2 = tpu.matmul %0, %1, %cst {dimension_numbers = #tpu.dot_dimension_numbers<[1], [0], [0], [1], [0, 0, 1, 1], [], []>} : vector<128x4xbf16>, vector<4x256xbf16>, vector<128x256xf32> -> vector<128x256xf32>
    %c0_3 = arith.constant 0 : index
    %c0_4 = arith.constant 0 : index
    %3 = vector.load %arg3[%c0_3, %c0_4] : memref<1x256xf32, #tpu.memory_space<vmem>>, vector<1x256xf32>
    %4 = vector.broadcast %3 : vector<1x256xf32> to vector<128x256xf32>
    %5 = arith.addf %2, %4 : vector<128x256xf32>
    %cst_5 = arith.constant 0.000000e+00 : f32
    %6 = vector.broadcast %cst_5 : f32 to vector<128x256xf32>
    %7 = arith.maximumf %5, %6 : vector<128x256xf32>
    %8 = arith.truncf %7 : vector<128x256xf32> to vector<128x256xbf16>
    %c0_6 = arith.constant 0 : index
    %c0_7 = arith.constant 0 : index
    %9 = vector.load %arg4[%c0_6, %c0_7] : memref<256x256xbf16, #tpu.memory_space<vmem>>, vector<256x256xbf16>
    %cst_8 = arith.constant dense<0.000000e+00> : vector<128x256xf32>
    %10 = tpu.matmul %8, %9, %cst_8 {dimension_numbers = #tpu.dot_dimension_numbers<[1], [0], [0], [1], [0, 0, 1, 1], [], []>} : vector<128x256xbf16>, vector<256x256xbf16>, vector<128x256xf32> -> vector<128x256xf32>
    %c0_9 = arith.constant 0 : index
    %c0_10 = arith.constant 0 : index
    %11 = vector.load %arg5[%c0_9, %c0_10] : memref<1x256xf32, #tpu.memory_space<vmem>>, vector<1x256xf32>
    %12 = vector.broadcast %11 : vector<1x256xf32> to vector<128x256xf32>
    %13 = arith.addf %10, %12 : vector<128x256xf32>
    %14 = arith.mulf %13, %13 : vector<128x256xf32>
    %cst_11 = arith.constant dense<0.000000e+00> : vector<128xf32>
    %15 = vector.multi_reduction <add>, %14, %cst_11 [1] : vector<128x256xf32> to vector<128xf32>
    %16 = vector.shape_cast %15 : vector<128xf32> to vector<128x1xf32>
    %17 = math.sqrt %16 : vector<128x1xf32>
    %cst_12 = arith.constant 1.000000e-07 : f32
    %18 = vector.broadcast %cst_12 : f32 to vector<128x1xf32>
    %19 = arith.addf %17, %18 : vector<128x1xf32>
    %20 = tpu.reciprocal %19 {approx = true} : vector<128x1xf32> -> vector<128x1xf32>
    %21 = vector.broadcast %20 : vector<128x1xf32> to vector<128x256xf32>
    %22 = arith.mulf %13, %21 : vector<128x256xf32>
    %c0_13 = arith.constant 0 : index
    %c0_14 = arith.constant 0 : index
    %23 = vector.load %arg6[%c0_13, %c0_14] : memref<128x256xf32, #tpu.memory_space<vmem>>, vector<128x256xf32>
    tpu.vector_store %arg6[%c0_13, %c0_14], %22 {strides = array<i32>} : memref<128x256xf32, #tpu.memory_space<vmem>>, vector<128x256xf32>,
    return
  }
  func.func @transform_0(%arg0: i32) -> (i32, i32) {
    %c0_i32 = arith.constant 0 : i32
    %c0_i32_0 = arith.constant 0 : i32
    return %arg0, %c0_i32 : i32, i32
  }
  func.func @transform_1(%arg0: i32) -> (i32, i32) {
    %c0_i32 = arith.constant 0 : i32
    %c0_i32_0 = arith.constant 0 : i32
    %c0_i32_1 = arith.constant 0 : i32
    return %c0_i32, %c0_i32_0 : i32, i32
  }
  func.func @transform_2(%arg0: i32) -> (i32, i32) {
    %c0_i32 = arith.constant 0 : i32
    %c0_i32_0 = arith.constant 0 : i32
    %c0_i32_1 = arith.constant 0 : i32
    return %c0_i32, %c0_i32_0 : i32, i32
  }
  func.func @transform_3(%arg0: i32) -> (i32, i32) {
    %c0_i32 = arith.constant 0 : i32
    %c0_i32_0 = arith.constant 0 : i32
    %c0_i32_1 = arith.constant 0 : i32
    return %c0_i32, %c0_i32_0 : i32, i32
  }
  func.func @transform_4(%arg0: i32) -> (i32, i32) {
    %c0_i32 = arith.constant 0 : i32
    %c0_i32_0 = arith.constant 0 : i32
    %c0_i32_1 = arith.constant 0 : i32
    return %c0_i32, %c0_i32_0 : i32, i32
  }
  func.func @transform_5(%arg0: i32) -> (i32, i32) {
    %c0_i32 = arith.constant 0 : i32
    %c0_i32_0 = arith.constant 0 : i32
    return %arg0, %c0_i32 : i32, i32
  }
}

</mosaic_0001>

<bundles_post_ra>
// kernel: tpu_custom_call.1
= control target key start
LH: loop header
LB: loop body
LE: loop exit
PB: predicated region body
PF: predicated region fallthrough
CT: control target
= control target key end

     0   :  { %10 = vsyncpa [#allocation3], 0  ;;  %s1598_s0 = inlined_call_operand.vmem [shape: bf16[128,4], index: 0, kind: input, shape index: {}]   ;;  %s1599_s1 = inlined_call_operand.vmem [shape: bf16[4,256], index: 1, kind: input, shape index: {}]   ;;  %s1600_s2 = inlined_call_operand.vmem [shape: f32[1,256], index: 2, kind: input, shape index: {}]   ;;  %s1601_s3 = inlined_call_operand.hbm [shape: bf16[256,256], index: 3, kind: input, shape index: {}]   ;;  %s1602_s4 = inlined_call_operand.vmem [shape: f32[1,256], index: 4, kind: input, shape index: {}]   ;;  %s1603_s5 = inlined_call_operand.hbm [shape: f32[128,256], index: 5, kind: output, shape index: {}]  }
   0x1   :  { %11 = vsyncpa [#allocation4], 0  ;;  %s1182_s18 = smov [#allocation2]  }
   0x2   :  { %s23_s19 = sshll.u32 %s1182_s18, 4  ;;  %s24_s19 = int_to_ptr.vmem [resolvable:$true] %s23_s19 }
   0x3   :  { %s1146_s20 = scalar_lea.vmem %s24_s19, 4096  ;;  %p1151_p1 = scmp.lt.s32.totalorder %s24_s19, %s24_s19 }
   0x4   :  { %p1147_p0 = scmp.ne.s32.totalorder %s24_s19, %s1146_s20  ;;  %p1152_p2 = scmp.lt.s32.totalorder %s1146_s20, %s1146_s20 }
   0x6   :  { %p1153_p3 = por %p1152_p2, %p1151_p1 }
   0x8   :  { %p1154_p4 = pnand %p1153_p3, %p1147_p0 }
   0xa   :  { %1157 = shalt.err (!%p1154_p4)
}
   0xb   :  { %s1183_s21 = smov 128   ;;  %s1184_s22 = smov 8  }
   0xc   :  { %29 = dma.hbm_to_vmem [thread:$0]  %s1601_s3, 4096, %s24_s19, [#allocation3], %s1183_s21, %s1183_s21, %s1184_s22  }
   0xd   :  { %1178 = dma.done.wait [#allocation3], 4096  }
   0xe   :  { %1179 = vsyncadd [#allocation3], 4294963200  ;;  %v1185_v0 = vmov 0   ;;  %vm139_vm0 = vcmask 1041408   ;;  %v1018_v4 = vld [vmem:[%s1598_s0] sm:$0xff]   ;;  %vm114_vm1 = vcmask 31744   ;;  %v55_v44 = vlaneseq }
   0xf   :  { %178 = vmatprep.mubr.bf16.mxu0 %v1185_v0  ;;  %v937_v1 = vld.sshfl [vmem:[%s1599_s1] sm:$0x33 pattern:$0x76325410]  ;;  %v1026_v5 = vld [vmem:[#allocation2 + $0x70] ss:$8 sps:$4 sm:$0xff]  }
  0x10   :  { %v113_v2 = vcombine.high %v937_v1, %v937_v1  ;;  %v141_v3 = vsel %vm139_vm0, %v937_v1, 0  ;;  %v1028_v6 = vld [vmem:[#allocation2 + $0x74] ss:$8 sps:$4 sm:$0xff]   ;;  %v1019_v7 = vld [vmem:[%s1598_s0 + $0x8] sm:$0xff]   ;;  %v1032_v11 = vld [vmem:[#allocation2 + $0x50] ss:$8 sps:$4 sm:$0xff]  }
  0x11   :  { %v1031_v8 = vld [vmem:[#allocation2 + $0x64] ss:$8 sps:$4 sm:$0xff]   ;;  %979 = vmatprep.subr.bf16.mxu1 %v1028_v6  ;;  %v1029_v9 = vld [vmem:[#allocation2 + $0x60] ss:$8 sps:$4 sm:$0xff]   ;;  %v1034_v10 = vld [vmem:[#allocation2 + $0x54] ss:$8 sps:$4 sm:$0xff]  }
  0x12   :  { %938 = vmatprep.subr.msk.bf16.mxu0 %vm139_vm0, %v113_v2  ;;  %995 = vmatpush1.bf16.msra.mxu1 %v1026_v5  ;;  %v1037_v12 = vld [vmem:[#allocation2 + $0x44] ss:$8 sps:$4 sm:$0xff]   ;;  %v1020_v13 = vld [vmem:[%s1598_s0 + $0x10] sm:$0xff]   ;;  %v1035_v14 = vld [vmem:[#allocation2 + $0x40] ss:$8 sps:$4 sm:$0xff]   ;;  %v1265_v45 = vshrl.u32 %v55_v44, 7 }
  0x13   :  { %161 = vmatpush1.bf16.msra.mxu0 %v141_v3  ;;  %980 = vmatprep.subr.bf16.mxu1 %v1031_v8  ;;  %v1040_v15 = vld [vmem:[#allocation2 + $0x34] ss:$8 sps:$4 sm:$0xff]   ;;  %v1038_v16 = vld [vmem:[#allocation2 + $0x30] ss:$8 sps:$4 sm:$0xff]   ;;  %v1043_v17 = vld [vmem:[#allocation2 + $0x24] ss:$8 sps:$4 sm:$0xff]  }
  0x14   :  { %511 = vmatprep.subr.bf16.mxu0 %v1028_v6  ;;  %v1021_v18 = vld [vmem:[%s1598_s0 + $0x18] sm:$0xff]   ;;  %v1041_v19 = vld [vmem:[#allocation2 + $0x20] ss:$8 sps:$4 sm:$0xff]   ;;  %v1049_v22 = vld [vmem:[#allocation2 + $0x4] ss:$8 sps:$4 sm:$0xff]   ;;  %v61_v46 = vsub.s32 1, %v1265_v45 }
  0x15   :  { %v1046_v20 = vld [vmem:[#allocation2 + $0x14] ss:$8 sps:$4 sm:$0xff]   ;;  %v1044_v21 = vld [vmem:[#allocation2 + $0x10] ss:$8 sps:$4 sm:$0xff]   ;;  %v1022_v23 = vld [vmem:[%s1598_s0 + $0x20] sm:$0xff]   ;;  %v57_v47 = vsub.s32 0, %v1265_v45 }
  0x16   :  { %939 = vmatmul.mubr.msk.bf16.vlgmr.msra.gmra.mxu0 %vm114_vm1, %v1018_v4  ;;  %996 = vmatpush1.bf16.msra.mxu1 %v1029_v9  ;;  %v1047_v24 = vld [vmem:[#allocation2] ss:$8 sps:$4 sm:$0xff]   ;;  %v1052_v25 = vld [vmem:[#allocation2 + $0xf4] ss:$8 sps:$4 sm:$0xff]   ;;  %v1050_v26 = vld [vmem:[#allocation2 + $0xf0] ss:$8 sps:$4 sm:$0xff]  }
  0x17   :  { %188 = vmatprep.mubr.bf16.mxu0 %v1185_v0  ;;  %512 = vmatpush1.bf16.msra.mxu0 %v1026_v5  ;;  %v1055_v27 = vld [vmem:[#allocation2 + $0xe4] ss:$8 sps:$4 sm:$0xff]   ;;  %v1053_v29 = vld [vmem:[#allocation2 + $0xe0] ss:$8 sps:$4 sm:$0xff]   ;;  %v1058_v30 = vld [vmem:[#allocation2 + $0xd4] ss:$8 sps:$4 sm:$0xff]  }
  0x18   :  { %513 = vmatprep.subr.bf16.mxu0 %v1031_v8  ;;  %981 = vmatprep.subr.bf16.mxu1 %v1034_v10  ;;  %v1023_v28 = vld [vmem:[%s1598_s0 + $0x28] sm:$0xff]   ;;  %v1056_v31 = vld [vmem:[#allocation2 + $0xd0] ss:$8 sps:$4 sm:$0xff]   ;;  %v1064_v35 = vld [vmem:[#allocation2 + $0xb4] ss:$8 sps:$4 sm:$0xff]  }
  0x19   :  { %v1061_v32 = vld [vmem:[#allocation2 + $0xc4] ss:$8 sps:$4 sm:$0xff]   ;;  %v1024_v33 = vld [vmem:[%s1598_s0 + $0x30] sm:$0xff]   ;;  %v1059_v34 = vld [vmem:[#allocation2 + $0xc0] ss:$8 sps:$4 sm:$0xff]  }
  0x1a   :  { %997 = vmatpush1.bf16.msra.mxu1 %v1032_v11  ;;  %v1062_v36 = vld [vmem:[#allocation2 + $0xb0] ss:$8 sps:$4 sm:$0xff]   ;;  %v1067_v38 = vld [vmem:[#allocation2 + $0xa4] ss:$8 sps:$4 sm:$0xff]   ;;  %v1065_v39 = vld [vmem:[#allocation2 + $0xa0] ss:$8 sps:$4 sm:$0xff]  }
  0x1b   :  { %514 = vmatpush1.bf16.msra.mxu0 %v1029_v9  ;;  %982 = vmatprep.subr.bf16.mxu1 %v1037_v12  ;;  %v1025_v37 = vld [vmem:[%s1598_s0 + $0x38] sm:$0xff]   ;;  %v1073_v42 = vld [vmem:[#allocation2 + $0x84] ss:$8 sps:$4 sm:$0xff]   ;;  %v1071_v43 = vld [vmem:[#allocation2 + $0x80] ss:$8 sps:$4 sm:$0xff]  }
  0x1c   :  { %515 = vmatprep.subr.bf16.mxu0 %v1034_v10  ;;  %v1070_v40 = vld [vmem:[#allocation2 + $0x94] ss:$8 sps:$4 sm:$0xff]   ;;  %v1068_v41 = vld [vmem:[#allocation2 + $0x90] ss:$8 sps:$4 sm:$0xff]   ;;  %v53_v48 = vld [vmem:[%s1600_s2] sm:$0x3] }
  0x1d   :  { %v1274_v50 = vrot.slane %v53_v48, %v61_v46  ;;  %v1278_v51 = vrot.slane %v53_v48, %v57_v47 }
  0x1e   :  { %940 = vmatmul.mubr.msk.bf16.gmra.mxu0 %vm114_vm1, %v1019_v7  ;;  %998 = vmatpush1.bf16.msra.mxu1 %v1035_v14 }
  0x1f   :  { %198 = vmatprep.mubr.bf16.mxu0 %v1185_v0  ;;  %516 = vmatpush1.bf16.msra.mxu0 %v1032_v11 }
  0x20   :  { %517 = vmatprep.subr.bf16.mxu0 %v1037_v12  ;;  %983 = vmatprep.subr.bf16.mxu1 %v1040_v15 }
  0x22   :  { %999 = vmatpush1.bf16.msra.mxu1 %v1038_v16 }
  0x23   :  { %518 = vmatpush1.bf16.msra.mxu0 %v1035_v14  ;;  %984 = vmatprep.subr.bf16.mxu1 %v1043_v17 }
  0x24   :  { %519 = vmatprep.subr.bf16.mxu0 %v1040_v15 }
  0x26   :  { %941 = vmatmul.mubr.msk.bf16.gmra.mxu0 %vm114_vm1, %v1020_v13  ;;  %1000 = vmatpush1.bf16.msra.mxu1 %v1041_v19 }
  0x27   :  { %208 = vmatprep.mubr.bf16.mxu0 %v1185_v0  ;;  %520 = vmatpush1.bf16.msra.mxu0 %v1038_v16 }
  0x28   :  { %521 = vmatprep.subr.bf16.mxu0 %v1043_v17  ;;  %985 = vmatprep.subr.bf16.mxu1 %v1046_v20 }
  0x2a   :  { %1001 = vmatpush1.bf16.msra.mxu1 %v1044_v21 }
  0x2b   :  { %522 = vmatpush1.bf16.msra.mxu0 %v1041_v19  ;;  %986 = vmatprep.subr.bf16.mxu1 %v1049_v22 }
  0x2c   :  { %523 = vmatprep.subr.bf16.mxu0 %v1046_v20 }
  0x2e   :  { %942 = vmatmul.mubr.msk.bf16.gmra.mxu0 %vm114_vm1, %v1021_v18  ;;  %1002 = vmatpush1.bf16.msra.mxu1 %v1047_v24 }
  0x2f   :  { %218 = vmatprep.mubr.bf16.mxu0 %v1185_v0  ;;  %524 = vmatpush1.bf16.msra.mxu0 %v1044_v21 }
  0x30   :  { %525 = vmatprep.subr.bf16.mxu0 %v1049_v22  ;;  %987 = vmatprep.subr.bf16.mxu1 %v1052_v25 }
  0x32   :  { %1003 = vmatpush2.bf16.msra.mxu1 %v1050_v26 }
  0x33   :  { %526 = vmatpush1.bf16.msra.mxu0 %v1047_v24  ;;  %988 = vmatprep.subr.bf16.mxu1 %v1055_v27 }
  0x34   :  { %527 = vmatprep.subr.bf16.mxu0 %v1052_v25 }
  0x36   :  { %943 = vmatmul.mubr.msk.bf16.gmra.mxu0 %vm114_vm1, %v1022_v23  ;;  %1004 = vmatpush2.bf16.msra.mxu1 %v1053_v29 }
  0x37   :  { %228 = vmatprep.mubr.bf16.mxu0 %v1185_v0  ;;  %528 = vmatpush2.bf16.msra.mxu0 %v1050_v26 }
  0x38   :  { %529 = vmatprep.subr.bf16.mxu0 %v1055_v27  ;;  %989 = vmatprep.subr.bf16.mxu1 %v1058_v30 }
  0x3a   :  { %1005 = vmatpush2.bf16.msra.mxu1 %v1056_v31 }
  0x3b   :  { %530 = vmatpush2.bf16.msra.mxu0 %v1053_v29  ;;  %990 = vmatprep.subr.bf16.mxu1 %v1061_v32 }
  0x3c   :  { %531 = vmatprep.subr.bf16.mxu0 %v1058_v30 }
  0x3e   :  { %944 = vmatmul.mubr.msk.bf16.gmra.mxu0 %vm114_vm1, %v1023_v28  ;;  %1006 = vmatpush2.bf16.msra.mxu1 %v1059_v34 }
  0x3f   :  { %238 = vmatprep.mubr.bf16.mxu0 %v1185_v0  ;;  %532 = vmatpush2.bf16.msra.mxu0 %v1056_v31 }
  0x40   :  { %533 = vmatprep.subr.bf16.mxu0 %v1061_v32  ;;  %991 = vmatprep.subr.bf16.mxu1 %v1064_v35 }
  0x42   :  { %1007 = vmatpush2.bf16.msra.mxu1 %v1062_v36 }
  0x43   :  { %534 = vmatpush2.bf16.msra.mxu0 %v1059_v34  ;;  %992 = vmatprep.subr.bf16.mxu1 %v1067_v38 }
  0x44   :  { %535 = vmatprep.subr.bf16.mxu0 %v1064_v35 }
  0x46   :  { %945 = vmatmul.mubr.msk.bf16.gmra.mxu0 %vm114_vm1, %v1024_v33  ;;  %1008 = vmatpush2.bf16.msra.mxu1 %v1065_v39 }
  0x47   :  { %248 = vmatprep.mubr.bf16.mxu0 %v1185_v0  ;;  %536 = vmatpush2.bf16.msra.mxu0 %v1062_v36 }
  0x48   :  { %537 = vmatprep.subr.bf16.mxu0 %v1067_v38  ;;  %993 = vmatprep.subr.bf16.mxu1 %v1070_v40 }
  0x4a   :  { %1009 = vmatpush2.bf16.msra.mxu1 %v1068_v41 }
  0x4b   :  { %538 = vmatpush2.bf16.msra.mxu0 %v1065_v39  ;;  %994 = vmatprep.subr.bf16.mxu1 %v1073_v42 }
  0x4c   :  { %539 = vmatprep.subr.bf16.mxu0 %v1070_v40 }
  0x4e   :  { %946 = vmatmul.mubr.msk.bf16.gmra.mxu0 %vm114_vm1, %v1025_v37  ;;  %1010 = vmatpush2.bf16.msra.mxu1 %v1071_v43 }
  0x4f   :  { %540 = vmatpush2.bf16.msra.mxu0 %v1068_v41 }
  0x50   :  { %541 = vmatprep.subr.bf16.mxu0 %v1073_v42 }
  0x53   :  { %542 = vmatpush2.bf16.msra.mxu0 %v1071_v43 }
  0xd6   :  { %v180_v49 = vpop.f32.mrf.mxu0 }
  0xd7   :  { %v181_v56 = vadd.f32 %v180_v49, %v1278_v51 }
  0xd8   :  { %v182_v52 = vpop.f32.mrf.mxu0 }
  0xd9   :  { %v183_v54 = vadd.f32 %v182_v52, %v1274_v50  ;;  %v259_v63 = vmax.f32 %v181_v56, 0.0 }
  0xda   :  { %v184_v53 = vpop.f32.mrf.mxu0 }
  0xdb   :  { %v185_v55 = vadd.f32 %v184_v53, %v1278_v51  ;;  %v260_v61 = vmax.f32 %v183_v54, 0.0 }
  0xdc   :  { %v186_v57 = vpop.f32.mrf.mxu0 }
  0xdd   :  { %v187_v58 = vadd.f32 %v186_v57, %v1274_v50  ;;  %v261_v59 = vmax.f32 %v185_v55, 0.0 }
  0xde   :  { %v190_v60 = vpop.f32.mrf.mxu0 }
  0xdf   :  { %v262_v62 = vmax.f32 %v187_v58, 0.0  ;;  %v291_v2 = vpack.c.bf16 %v261_v59, %v259_v63  ;;  %v191_v6 = vadd.f32 %v190_v60, %v1278_v51 }
  0xe0   :  { %v192_v0 = vpop.f32.mrf.mxu0 }
  0xe1   :  { %v292_v1 = vpack.c.bf16 %v262_v62, %v260_v61  ;;  %v193_v4 = vadd.f32 %v192_v0, %v1274_v50  ;;  %v263_v13 = vmax.f32 %v191_v6, 0.0 }
  0xe2   :  { %v194_v3 = vpop.f32.mrf.mxu0 }
  0xe3   :  { %v195_v5 = vadd.f32 %v194_v3, %v1278_v51  ;;  %543 = vmatprep.mubr.bf16.mxu0 %v292_v1  ;;  %v264_v11 = vmax.f32 %v193_v4, 0.0 }
  0xe4   :  { %v196_v7 = vpop.f32.mrf.mxu0  ;;  %544 = vmatmul.mubr.bf16.vlgmr.msra.gmra.mxu0 %v291_v2 }
  0xe5   :  { %v197_v8 = vadd.f32 %v196_v7, %v1274_v50  ;;  %v265_v9 = vmax.f32 %v195_v5, 0.0 }
  0xe6   :  { %v200_v10 = vpop.f32.mrf.mxu0 }
  0xe7   :  { %v266_v12 = vmax.f32 %v197_v8, 0.0  ;;  %v293_v16 = vpack.c.bf16 %v265_v9, %v263_v13  ;;  %v201_v20 = vadd.f32 %v200_v10, %v1278_v51 }
  0xe8   :  { %v202_v14 = vpop.f32.mrf.mxu0 }
  0xe9   :  { %v294_v15 = vpack.c.bf16 %v266_v12, %v264_v11  ;;  %v203_v18 = vadd.f32 %v202_v14, %v1274_v50  ;;  %v267_v27 = vmax.f32 %v201_v20, 0.0 }
  0xea   :  { %v204_v17 = vpop.f32.mrf.mxu0 }
  0xeb   :  { %v205_v19 = vadd.f32 %v204_v17, %v1278_v51  ;;  %553 = vmatprep.mubr.bf16.mxu0 %v294_v15  ;;  %v268_v25 = vmax.f32 %v203_v18, 0.0 }
  0xec   :  { %v206_v21 = vpop.f32.mrf.mxu0  ;;  %554 = vmatmul.mubr.bf16.gmra.mxu0 %v293_v16 }
  0xed   :  { %v207_v22 = vadd.f32 %v206_v21, %v1274_v50  ;;  %v269_v23 = vmax.f32 %v205_v19, 0.0 }
  0xee   :  { %v210_v24 = vpop.f32.mrf.mxu0 }
  0xef   :  { %v270_v26 = vmax.f32 %v207_v22, 0.0  ;;  %v295_v30 = vpack.c.bf16 %v269_v23, %v267_v27  ;;  %v211_v34 = vadd.f32 %v210_v24, %v1278_v51 }
  0xf0   :  { %v212_v28 = vpop.f32.mrf.mxu0 }
  0xf1   :  { %v296_v29 = vpack.c.bf16 %v270_v26, %v268_v25  ;;  %v213_v32 = vadd.f32 %v212_v28, %v1274_v50  ;;  %v271_v41 = vmax.f32 %v211_v34, 0.0 }
  0xf2   :  { %v214_v31 = vpop.f32.mrf.mxu0 }
  0xf3   :  { %v215_v33 = vadd.f32 %v214_v31, %v1278_v51  ;;  %563 = vmatprep.mubr.bf16.mxu0 %v296_v29  ;;  %v272_v39 = vmax.f32 %v213_v32, 0.0 }
  0xf4   :  { %v216_v35 = vpop.f32.mrf.mxu0  ;;  %564 = vmatmul.mubr.bf16.gmra.mxu0 %v295_v30 }
  0xf5   :  { %v217_v36 = vadd.f32 %v216_v35, %v1274_v50  ;;  %v273_v37 = vmax.f32 %v215_v33, 0.0 }
  0xf6   :  { %v220_v38 = vpop.f32.mrf.mxu0 }
  0xf7   :  { %v274_v40 = vmax.f32 %v217_v36, 0.0  ;;  %v297_v44 = vpack.c.bf16 %v273_v37, %v271_v41  ;;  %v221_v53 = vadd.f32 %v220_v38, %v1278_v51 }
  0xf8   :  { %v222_v42 = vpop.f32.mrf.mxu0 }
  0xf9   :  { %v298_v43 = vpack.c.bf16 %v274_v40, %v272_v39  ;;  %v223_v49 = vadd.f32 %v222_v42, %v1274_v50  ;;  %v275_v60 = vmax.f32 %v221_v53, 0.0  ;;  %v339_v40 = vld [vmem:[%s1602_s4] sm:$0x3]  ;;  %s1186_s4 = smov [#allocation5]  }
  0xfa   :  { %v224_v48 = vpop.f32.mrf.mxu0  ;;  %v1317_v41 = vrot.slane %v339_v40, %v57_v47  ;;  %s917_s18 = sshll.u32 %s1186_s4, 4  ;;  %s918_s18 = int_to_ptr.vmem [resolvable:$true] %s917_s18 }
  0xfb   :  { %v225_v52 = vadd.f32 %v224_v48, %v1278_v51  ;;  %573 = vmatprep.mubr.bf16.mxu1 %v298_v43  ;;  %v276_v58 = vmax.f32 %v223_v49, 0.0  ;;  %s1158_s19 = scalar_lea.vmem %s918_s18, 4096  ;;  %p1163_p6 = scmp.lt.s32.totalorder %s918_s18, %s918_s18 }
  0xfc   :  { %v226_v54 = vpop.f32.mrf.mxu0  ;;  %574 = vmatmul.mubr.bf16.vlgmr.msra.gmra.mxu1 %v297_v44  ;;  %p1159_p5 = scmp.ne.s32.totalorder %s918_s18, %s1158_s19  ;;  %p1164_p7 = scmp.lt.s32.totalorder %s1158_s19, %s1158_s19 }
  0xfd   :  { %v227_v55 = vadd.f32 %v226_v54, %v1274_v50  ;;  %v277_v56 = vmax.f32 %v225_v52, 0.0 }
  0xfe   :  { %v230_v57 = vpop.f32.mrf.mxu0  ;;  %p1165_p8 = por %p1164_p7, %p1163_p6 }
  0xff   :  { %v278_v59 = vmax.f32 %v227_v55, 0.0  ;;  %v299_v63 = vpack.c.bf16 %v277_v56, %v275_v60  ;;  %v231_v3 = vadd.f32 %v230_v57, %v1278_v51 }
 0x100   :  { %v232_v61 = vpop.f32.mrf.mxu0  ;;  %p1166_p9 = pnand %p1165_p8, %p1159_p5 }
 0x101   :  { %v300_v62 = vpack.c.bf16 %v278_v59, %v276_v58  ;;  %v233_v1 = vadd.f32 %v232_v61, %v1274_v50  ;;  %v279_v10 = vmax.f32 %v231_v3, 0.0 }
 0x102   :  { %v234_v0 = vpop.f32.mrf.mxu0 }
 0x103   :  { %v235_v2 = vadd.f32 %v234_v0, %v1278_v51  ;;  %583 = vmatprep.mubr.bf16.mxu1 %v300_v62  ;;  %v280_v8 = vmax.f32 %v233_v1, 0.0 }
 0x104   :  { %v236_v4 = vpop.f32.mrf.mxu0  ;;  %584 = vmatmul.mubr.bf16.gmra.mxu1 %v299_v63 }
 0x105   :  { %v237_v5 = vadd.f32 %v236_v4, %v1274_v50  ;;  %v281_v6 = vmax.f32 %v235_v2, 0.0 }
 0x106   :  { %v240_v7 = vpop.f32.mrf.mxu0 }
 0x107   :  { %v282_v9 = vmax.f32 %v237_v5, 0.0  ;;  %v301_v13 = vpack.c.bf16 %v281_v6, %v279_v10  ;;  %v241_v17 = vadd.f32 %v240_v7, %v1278_v51 }
 0x108   :  { %v242_v11 = vpop.f32.mrf.mxu0 }
 0x109   :  { %v302_v12 = vpack.c.bf16 %v282_v9, %v280_v8  ;;  %v243_v15 = vadd.f32 %v242_v11, %v1274_v50  ;;  %v283_v24 = vmax.f32 %v241_v17, 0.0 }
 0x10a   :  { %v244_v14 = vpop.f32.mrf.mxu0 }
 0x10b   :  { %v245_v16 = vadd.f32 %v244_v14, %v1278_v51  ;;  %593 = vmatprep.mubr.bf16.mxu1 %v302_v12  ;;  %v284_v22 = vmax.f32 %v243_v15, 0.0 }
 0x10c   :  { %v246_v18 = vpop.f32.mrf.mxu0  ;;  %594 = vmatmul.mubr.bf16.gmra.mxu1 %v301_v13 }
 0x10d   :  { %v247_v19 = vadd.f32 %v246_v18, %v1274_v50  ;;  %v285_v20 = vmax.f32 %v245_v16, 0.0 }
 0x10e   :  { %v250_v21 = vpop.f32.mrf.mxu0 }
 0x10f   :  { %v286_v23 = vmax.f32 %v247_v19, 0.0  ;;  %v303_v27 = vpack.c.bf16 %v285_v20, %v283_v24  ;;  %v251_v31 = vadd.f32 %v250_v21, %v1278_v51 }
 0x110   :  { %v252_v25 = vpop.f32.mrf.mxu0 }
 0x111   :  { %v304_v26 = vpack.c.bf16 %v286_v23, %v284_v22  ;;  %v253_v29 = vadd.f32 %v252_v25, %v1274_v50  ;;  %v287_v37 = vmax.f32 %v251_v31, 0.0 }
 0x112   :  { %v254_v28 = vpop.f32.mrf.mxu0 }
 0x113   :  { %v255_v30 = vadd.f32 %v254_v28, %v1278_v51  ;;  %603 = vmatprep.mubr.bf16.mxu1 %v304_v26  ;;  %v288_v35 = vmax.f32 %v253_v29, 0.0  ;;  %v1321_v51 = vrot.slane %v339_v40, %v61_v46 }
 0x114   :  { %v256_v32 = vpop.f32.mrf.mxu0  ;;  %604 = vmatmul.mubr.bf16.gmra.mxu1 %v303_v27 }
 0x115   :  { %v257_v33 = vadd.f32 %v256_v32, %v1274_v50  ;;  %v289_v34 = vmax.f32 %v255_v30, 0.0 }
 0x117   :  { %v290_v36 = vmax.f32 %v257_v33, 0.0  ;;  %v305_v39 = vpack.c.bf16 %v289_v34, %v287_v37 }
 0x119   :  { %v306_v38 = vpack.c.bf16 %v290_v36, %v288_v35 }
 0x11b   :  { %613 = vmatprep.mubr.bf16.mxu1 %v306_v38 }
 0x11c   :  { %614 = vmatmul.mubr.bf16.gmra.mxu1 %v305_v39 }
 0x1a4   :  { %v545_v50 = vpop.f32.mrf.mxu0 }
 0x1a5   :  { %v1324_v42 = vadd.f32 %v545_v50, %v1317_v41 }
 0x1a6   :  { %v547_v43 = vpop.f32.mrf.mxu0 }
 0x1a7   :  { %v1327_v44 = vadd.f32 %v547_v43, %v1321_v51  ;;  %v624_v47 = vmul.f32 %v1324_v42, %v1324_v42 }
 0x1a8   :  { %v549_v48 = vpop.f32.mrf.mxu0 }
 0x1a9   :  { %v1330_v49 = vadd.f32 %v549_v48, %v1317_v41  ;;  %v625_v45 = vmul.f32 %v1327_v44, %v1327_v44 }
 0x1aa   :  { %v551_v46 = vpop.f32.mrf.mxu0 }
 0x1ab   :  { %v1337_v52 = vadd.f32 %v551_v46, %v1321_v51  ;;  %v656_v53 = vadd.f32 %v625_v45, %v624_v47  ;;  %v626_v55 = vmul.f32 %v1330_v49, %v1330_v49 }
 0x1ac   :  { %v555_v54 = vpop.f32.mrf.mxu0 }
 0x1ad   :  { %v627_v56 = vmul.f32 %v1337_v52, %v1337_v52  ;;  %v1344_v57 = vadd.f32 %v555_v54, %v1317_v41  ;;  %657 = vadd.xlane.f32.xlu0 %v656_v53 }
 0x1ae   :  { %v557_v58 = vpop.f32.mrf.mxu0 }
 0x1af   :  { %v1347_v59 = vadd.f32 %v557_v58, %v1321_v51  ;;  %v659_v60 = vadd.f32 %v627_v56, %v626_v55  ;;  %v628_v63 = vmul.f32 %v1344_v57, %v1344_v57 }
 0x1b0   :  { %v559_v61 = vpop.f32.mrf.mxu0 }
 0x1b1   :  { %v1350_v62 = vadd.f32 %v559_v61, %v1317_v41  ;;  %660 = vadd.xlane.f32.xlu0 %v659_v60  ;;  %v629_v0 = vmul.f32 %v1347_v59, %v1347_v59 }
 0x1b2   :  { %v561_v1 = vpop.f32.mrf.mxu0 }
 0x1b3   :  { %v1357_v2 = vadd.f32 %v561_v1, %v1321_v51  ;;  %v662_v3 = vadd.f32 %v629_v0, %v628_v63  ;;  %v630_v5 = vmul.f32 %v1350_v62, %v1350_v62 }
 0x1b4   :  { %v565_v4 = vpop.f32.mrf.mxu0 }
 0x1b5   :  { %v631_v6 = vmul.f32 %v1357_v2, %v1357_v2  ;;  %v1364_v7 = vadd.f32 %v565_v4, %v1317_v41  ;;  %663 = vadd.xlane.f32.xlu1 %v662_v3 }
 0x1b6   :  { %v567_v8 = vpop.f32.mrf.mxu0 }
 0x1b7   :  { %v1367_v9 = vadd.f32 %v567_v8, %v1321_v51  ;;  %v665_v10 = vadd.f32 %v631_v6, %v630_v5  ;;  %v632_v12 = vmul.f32 %v1364_v7, %v1364_v7 }
 0x1b8   :  { %v569_v11 = vpop.f32.mrf.mxu0 }
 0x1b9   :  { %v633_v13 = vmul.f32 %v1367_v9, %v1367_v9  ;;  %v1374_v14 = vadd.f32 %v569_v11, %v1317_v41  ;;  %666 = vadd.xlane.f32.xlu1 %v665_v10 }
 0x1ba   :  { %v571_v15 = vpop.f32.mrf.mxu0 }
 0x1bb   :  { %v1377_v16 = vadd.f32 %v571_v15, %v1321_v51  ;;  %v668_v17 = vadd.f32 %v633_v13, %v632_v12  ;;  %v634_v19 = vmul.f32 %v1374_v14, %v1374_v14 }
 0x1bc   :  { %v575_v18 = vpop.f32.mrf.mxu1 }
 0x1bd   :  { %v635_v20 = vmul.f32 %v1377_v16, %v1377_v16  ;;  %v1384_v21 = vadd.f32 %v575_v18, %v1317_v41  ;;  %669 = vadd.xlane.f32.xlu0 %v668_v17 }
 0x1be   :  { %v577_v22 = vpop.f32.mrf.mxu1 }
 0x1bf   :  { %v1387_v23 = vadd.f32 %v577_v22, %v1321_v51  ;;  %v671_v24 = vadd.f32 %v635_v20, %v634_v19  ;;  %v636_v26 = vmul.f32 %v1384_v21, %v1384_v21 }
 0x1c0   :  { %v579_v25 = vpop.f32.mrf.mxu1 }
 0x1c1   :  { %v637_v27 = vmul.f32 %v1387_v23, %v1387_v23  ;;  %v1394_v28 = vadd.f32 %v579_v25, %v1317_v41  ;;  %672 = vadd.xlane.f32.xlu1 %v671_v24 }
 0x1c2   :  { %v581_v29 = vpop.f32.mrf.mxu1 }
 0x1c3   :  { %v1397_v30 = vadd.f32 %v581_v29, %v1321_v51  ;;  %v674_v31 = vadd.f32 %v637_v27, %v636_v26  ;;  %v638_v33 = vmul.f32 %v1394_v28, %v1394_v28 }
 0x1c4   :  { %v585_v32 = vpop.f32.mrf.mxu1 }
 0x1c5   :  { %v639_v34 = vmul.f32 %v1397_v30, %v1397_v30  ;;  %v1404_v35 = vadd.f32 %v585_v32, %v1317_v41  ;;  %675 = vadd.xlane.f32.xlu0 %v674_v31 }
 0x1c6   :  { %v587_v36 = vpop.f32.mrf.mxu1 }
 0x1c7   :  { %v1407_v37 = vadd.f32 %v587_v36, %v1321_v51  ;;  %v677_v38 = vadd.f32 %v639_v34, %v638_v33  ;;  %v640_v40 = vmul.f32 %v1404_v35, %v1404_v35 }
 0x1c8   :  { %v589_v39 = vpop.f32.mrf.mxu1 }
 0x1c9   :  { %v641_v50 = vmul.f32 %v1407_v37, %v1407_v37  ;;  %v1414_v43 = vadd.f32 %v589_v39, %v1317_v41  ;;  %678 = vadd.xlane.f32.xlu1 %v677_v38 }
 0x1ca   :  { %v591_v48 = vpop.f32.mrf.mxu1 }
 0x1cb   :  { %v1417_v47 = vadd.f32 %v591_v48, %v1321_v51  ;;  %v680_v45 = vadd.f32 %v641_v50, %v640_v40  ;;  %v642_v53 = vmul.f32 %v1414_v43, %v1414_v43 }
 0x1cc   :  { %v595_v46 = vpop.f32.mrf.mxu1 }
 0x1cd   :  { %v643_v54 = vmul.f32 %v1417_v47, %v1417_v47  ;;  %v1424_v55 = vadd.f32 %v595_v46, %v1317_v41  ;;  %681 = vadd.xlane.f32.xlu0 %v680_v45 }
 0x1ce   :  { %v597_v56 = vpop.f32.mrf.mxu1 }
 0x1cf   :  { %v1427_v58 = vadd.f32 %v597_v56, %v1321_v51  ;;  %v683_v60 = vadd.f32 %v643_v54, %v642_v53  ;;  %v644_v63 = vmul.f32 %v1424_v55, %v1424_v55 }
 0x1d0   :  { %v599_v61 = vpop.f32.mrf.mxu1 }
 0x1d1   :  { %v645_v0 = vmul.f32 %v1427_v58, %v1427_v58  ;;  %v1434_v1 = vadd.f32 %v599_v61, %v1317_v41  ;;  %684 = vadd.xlane.f32.xlu1 %v683_v60 }
 0x1d2   :  { %v601_v3 = vpop.f32.mrf.mxu1 }
 0x1d3   :  { %v1437_v4 = vadd.f32 %v601_v3, %v1321_v51  ;;  %v686_v5 = vadd.f32 %v645_v0, %v644_v63  ;;  %v646_v8 = vmul.f32 %v1434_v1, %v1434_v1 }
 0x1d4   :  { %v605_v6 = vpop.f32.mrf.mxu1 }
 0x1d5   :  { %v647_v10 = vmul.f32 %v1437_v4, %v1437_v4  ;;  %v1444_v11 = vadd.f32 %v605_v6, %v1317_v41  ;;  %687 = vadd.xlane.f32.xlu0 %v686_v5 }
 0x1d6   :  { %v607_v12 = vpop.f32.mrf.mxu1 }
 0x1d7   :  { %v1447_v13 = vadd.f32 %v607_v12, %v1321_v51  ;;  %v689_v15 = vadd.f32 %v647_v10, %v646_v8  ;;  %v648_v18 = vmul.f32 %v1444_v11, %v1444_v11 }
 0x1d8   :  { %v609_v17 = vpop.f32.mrf.mxu1 }
 0x1d9   :  { %v649_v19 = vmul.f32 %v1447_v13, %v1447_v13  ;;  %v1454_v20 = vadd.f32 %v609_v17, %v1317_v41  ;;  %690 = vadd.xlane.f32.xlu1 %v689_v15 }
 0x1da   :  { %v611_v22 = vpop.f32.mrf.mxu1 }
 0x1db   :  { %v1457_v24 = vadd.f32 %v611_v22, %v1321_v51  ;;  %v692_v25 = vadd.f32 %v649_v19, %v648_v18  ;;  %v650_v27 = vmul.f32 %v1454_v20, %v1454_v20 }
 0x1dc   :  { %v615_v26 = vpop.f32.mrf.mxu1 }
 0x1dd   :  { %v651_v29 = vmul.f32 %v1457_v24, %v1457_v24  ;;  %v1464_v31 = vadd.f32 %v615_v26, %v1317_v41  ;;  %693 = vadd.xlane.f32.xlu0 %v692_v25 }
 0x1de   :  { %v617_v32 = vpop.f32.mrf.mxu1 }
 0x1df   :  { %v1467_v33 = vadd.f32 %v617_v32, %v1321_v51  ;;  %v695_v34 = vadd.f32 %v651_v29, %v650_v27  ;;  %v652_v38 = vmul.f32 %v1464_v31, %v1464_v31 }
 0x1e0   :  { %v619_v36 = vpop.f32.mrf.mxu1 }
 0x1e1   :  { %v653_v39 = vmul.f32 %v1467_v33, %v1467_v33  ;;  %v1474_v40 = vadd.f32 %v619_v36, %v1317_v41  ;;  %696 = vadd.xlane.f32.xlu1 %v695_v34 }
 0x1e2   :  { %v621_v50 = vpop.f32.mrf.mxu1 }
 0x1e3   :  { %v1477_v48 = vadd.f32 %v621_v50, %v1321_v51  ;;  %v698_v45 = vadd.f32 %v653_v39, %v652_v38  ;;  %v654_v46 = vmul.f32 %v1474_v40, %v1474_v40 }
 0x1e5   :  { %v655_v53 = vmul.f32 %v1477_v48, %v1477_v48  ;;  %699 = vadd.xlane.f32.xlu0 %v698_v45 }
 0x1e7   :  { %v701_v54 = vadd.f32 %v655_v53, %v654_v46 }
 0x1e9   :  { %702 = vadd.xlane.f32.xlu1 %v701_v54 }
 0x236   :  { %v658_v56 = vpop.xlane.xlu0 %657 }
 0x237   :  { %1074 = vrsqrt.f32 %v658_v56  ;;  %vm706_vm2 = vcmp.eq.f32.partialorder %v658_v56, inf  ;;  %v709_v0 = vand.u32 2147483648, %v658_v56  ;;  %vm708_vm3 = vcmp.eq.f32.partialorder %v658_v56, 0.0 }
 0x23a   :  { %v661_v60 = vpop.xlane.xlu0 %660 }
 0x23b   :  { %1076 = vrsqrt.f32 %v661_v60  ;;  %vm713_vm4 = vcmp.eq.f32.partialorder %v661_v60, inf  ;;  %v716_v15 = vand.u32 2147483648, %v661_v60  ;;  %vm715_vm5 = vcmp.eq.f32.partialorder %v661_v60, 0.0 }
 0x23e   :  { %v664_v41 = vpop.xlane.xlu1 %663 }
 0x23f   :  { %1078 = vrsqrt.f32 %v664_v41  ;;  %vm720_vm6 = vcmp.eq.f32.partialorder %v664_v41, inf  ;;  %v723_v27 = vand.u32 2147483648, %v664_v41  ;;  %vm722_vm7 = vcmp.eq.f32.partialorder %v664_v41, 0.0 }
 0x242   :  { %v667_v61 = vpop.xlane.xlu1 %666 }
 0x243   :  { %1080 = vrsqrt.f32 %v667_v61  ;;  %vm727_vm8 = vcmp.eq.f32.partialorder %v667_v61, inf  ;;  %v730_v50 = vand.u32 2147483648, %v667_v61  ;;  %vm729_vm9 = vcmp.eq.f32.partialorder %v667_v61, 0.0 }
 0x244   :  { %v1075_v51 = vpop.eup %1074 }
 0x245   :  { %v705_v63 = vmul.f32 %v1075_v51, %v658_v56 }
 0x246   :  { %v670_v3 = vpop.xlane.xlu0 %669 }
 0x247   :  { %v707_v5 = vsel %vm706_vm2, %v658_v56, %v705_v63  ;;  %1082 = vrsqrt.f32 %v670_v3  ;;  %vm734_vm10 = vcmp.eq.f32.partialorder %v670_v3, inf  ;;  %vm736_vm11 = vcmp.eq.f32.partialorder %v670_v3, 0.0 }
 0x248   :  { %v1077_v6 = vpop.eup %1076  ;;  %v710_v8 = vsel %vm708_vm3, %v709_v0, %v707_v5 }
 0x249   :  { %v816_v10 = vadd.f32 1e-07, %v710_v8  ;;  %v712_v12 = vmul.f32 %v1077_v6, %v661_v60 }
 0x24a   :  { %v673_v17 = vpop.xlane.xlu1 %672 }
 0x24b   :  { %1084 = vrcp.f32 %v816_v10  ;;  %v714_v18 = vsel %vm713_vm4, %v661_v60, %v712_v12  ;;  %vm741_vm12 = vcmp.eq.f32.partialorder %v673_v17, inf  ;;  %vm743_vm13 = vcmp.eq.f32.partialorder %v673_v17, 0.0 }
 0x24c   :  { %v1079_v19 = vpop.eup %1078  ;;  %v717_v22 = vsel %vm715_vm5, %v716_v15, %v714_v18  ;;  %1086 = vrsqrt.f32 %v673_v17  ;;  %v744_v18 = vand.u32 2147483648, %v673_v17 }
 0x24d   :  { %v817_v25 = vadd.f32 1e-07, %v717_v22  ;;  %v719_v26 = vmul.f32 %v1079_v19, %v664_v41 }
 0x24e   :  { %v1483_v29 = vpop.xlane.xlu0 %675 }
 0x24f   :  { %1088 = vrcp.f32 %v817_v25  ;;  %v721_v32 = vsel %vm720_vm6, %v664_v41, %v719_v26  ;;  %v737_v41 = vand.u32 2147483648, %v670_v3  ;;  %vm748_vm14 = vcmp.eq.f32.partialorder %v1483_v29, inf }
 0x250   :  { %v1081_v34 = vpop.eup %1080  ;;  %v724_v36 = vsel %vm722_vm7, %v723_v27, %v721_v32  ;;  %1090 = vrsqrt.f32 %v1483_v29  ;;  %vm750_vm15 = vcmp.eq.f32.partialorder %v1483_v29, 0.0 }
 0x251   :  { %v818_v38 = vadd.f32 1e-07, %v724_v36  ;;  %v726_v39 = vmul.f32 %v1081_v34, %v667_v61  ;;  %v751_v34 = vand.u32 2147483648, %v1483_v29 }
 0x252   :  { %v1486_v45 = vpop.xlane.xlu1 %678 }
 0x253   :  { %1092 = vrcp.f32 %v818_v38  ;;  %v728_v46 = vsel %vm727_vm8, %v667_v61, %v726_v39  ;;  %vm755_vm0 = vcmp.eq.f32.partialorder %v1486_v45, inf  ;;  %vm757_vm1 = vcmp.eq.f32.partialorder %v1486_v45, 0.0 }
 0x254   :  { %v1083_v53 = vpop.eup %1082  ;;  %v731_v54 = vsel %vm729_vm9, %v730_v50, %v728_v46  ;;  %1094 = vrsqrt.f32 %v1486_v45 }
 0x255   :  { %v819_v56 = vadd.f32 1e-07, %v731_v54  ;;  %v733_v60 = vmul.f32 %v1083_v53, %v670_v3  ;;  %v758_v54 = vand.u32 2147483648, %v1486_v45 }
 0x256   :  { %v1489_v51 = vpop.xlane.xlu0 %681 }
 0x257   :  { %1096 = vrcp.f32 %v819_v56  ;;  %v735_v63 = vsel %vm734_vm10, %v670_v3, %v733_v60  ;;  %vm762_vm2 = vcmp.eq.f32.partialorder %v1489_v51, inf  ;;  %vm764_vm3 = vcmp.eq.f32.partialorder %v1489_v51, 0.0 }
 0x258   :  { %v1085_v0 = vpop.eup %1084  ;;  %v738_v5 = vsel %vm736_vm11, %v737_v41, %v735_v63  ;;  %1098 = vrsqrt.f32 %v1489_v51 }
 0x259   :  { %v1087_v6 = vpop.eup %1086  ;;  %v848_v61 = vmul.f32 %v1085_v0, %v1324_v42  ;;  %v849_v8 = vmul.f32 %v1085_v0, %v1327_v44  ;;  %v820_v10 = vadd.f32 1e-07, %v738_v5 }
 0x25a   :  { %v740_v12 = vmul.f32 %v1087_v6, %v673_v17  ;;  %v1494_v15 = vpop.xlane.xlu1 %684  ;;  %v765_v6 = vand.u32 2147483648, %v1489_v51 }
 0x25b   :  { %880 = vst [vmem:[#allocation5] sm:$0xff] %v848_v61  ;;  %881 = vst [vmem:[#allocation5 + $0x8] sm:$0xff] %v849_v8  ;;  %1100 = vrcp.f32 %v820_v10  ;;  %vm769_vm4 = vcmp.eq.f32.partialorder %v1494_v15, inf  ;;  %vm771_vm5 = vcmp.eq.f32.partialorder %v1494_v15, 0.0 }
 0x25c   :  { %v1089_v19 = vpop.eup %1088  ;;  %v742_v3 = vsel %vm741_vm12, %v673_v17, %v740_v12  ;;  %1102 = vrsqrt.f32 %v1494_v15 }
 0x25d   :  { %v1091_v22 = vpop.eup %1090  ;;  %v850_v25 = vmul.f32 %v1089_v19, %v1330_v49  ;;  %v851_v42 = vmul.f32 %v1089_v19, %v1337_v52  ;;  %v745_v44 = vsel %vm743_vm13, %v744_v18, %v742_v3  ;;  %v772_v3 = vand.u32 2147483648, %v1494_v15 }
 0x25e   :  { %v821_v26 = vadd.f32 1e-07, %v745_v44  ;;  %v747_v27 = vmul.f32 %v1091_v22, %v1483_v29  ;;  %v1500_v32 = vpop.xlane.xlu0 %687 }
 0x25f   :  { %882 = vst [vmem:[#allocation5 + $0x10] sm:$0xff] %v850_v25  ;;  %883 = vst [vmem:[#allocation5 + $0x18] sm:$0xff] %v851_v42  ;;  %1104 = vrsqrt.f32 %v1500_v32  ;;  %vm776_vm6 = vcmp.eq.f32.partialorder %v1500_v32, inf  ;;  %vm778_vm7 = vcmp.eq.f32.partialorder %v1500_v32, 0.0 }
 0x260   :  { %v1093_v17 = vpop.eup %1092  ;;  %1106 = vrcp.f32 %v821_v26  ;;  %v749_v49 = vsel %vm748_vm14, %v1483_v29, %v747_v27  ;;  %v779_v27 = vand.u32 2147483648, %v1500_v32 }
 0x261   :  { %v1095_v52 = vpop.eup %1094  ;;  %v852_v36 = vmul.f32 %v1093_v17, %v1344_v57  ;;  %v853_v38 = vmul.f32 %v1093_v17, %v1347_v59  ;;  %v752_v39 = vsel %vm750_vm15, %v751_v34, %v749_v49 }
 0x262   :  { %v822_v50 = vadd.f32 1e-07, %v752_v39  ;;  %v754_v46 = vmul.f32 %v1095_v52, %v1486_v45  ;;  %v1510_v53 = vpop.xlane.xlu1 %690 }
 0x263   :  { %884 = vst [vmem:[#allocation5 + $0x20] sm:$0xff] %v852_v36  ;;  %885 = vst [vmem:[#allocation5 + $0x28] sm:$0xff] %v853_v38  ;;  %1108 = vrsqrt.f32 %v1510_v53  ;;  %vm783_vm8 = vcmp.eq.f32.partialorder %v1510_v53, inf  ;;  %v786_v39 = vand.u32 2147483648, %v1510_v53  ;;  %vm785_vm9 = vcmp.eq.f32.partialorder %v1510_v53, 0.0 }
 0x264   :  { %v1097_v29 = vpop.eup %1096  ;;  %1110 = vrcp.f32 %v822_v50  ;;  %v756_v57 = vsel %vm755_vm0, %v1486_v45, %v754_v46 }
 0x265   :  { %v1099_v59 = vpop.eup %1098  ;;  %v854_v56 = vmul.f32 %v1097_v29, %v1350_v62  ;;  %v855_v60 = vmul.f32 %v1097_v29, %v1357_v2  ;;  %v759_v41 = vsel %vm757_vm1, %v758_v54, %v756_v57 }
 0x266   :  { %v823_v63 = vadd.f32 1e-07, %v759_v41  ;;  %v761_v0 = vmul.f32 %v1099_v59, %v1489_v51  ;;  %v1520_v5 = vpop.xlane.xlu0 %693 }
 0x267   :  { %886 = vst [vmem:[#allocation5 + $0x30] sm:$0xff] %v854_v56  ;;  %887 = vst [vmem:[#allocation5 + $0x38] sm:$0xff] %v855_v60  ;;  %1112 = vrsqrt.f32 %v1520_v5  ;;  %vm790_vm10 = vcmp.eq.f32.partialorder %v1520_v5, inf  ;;  %v793_v56 = vand.u32 2147483648, %v1520_v5  ;;  %vm792_vm11 = vcmp.eq.f32.partialorder %v1520_v5, 0.0 }
 0x268   :  { %v1101_v45 = vpop.eup %1100  ;;  %1114 = vrcp.f32 %v823_v63  ;;  %v763_v62 = vsel %vm762_vm2, %v1489_v51, %v761_v0 }
 0x269   :  { %v1103_v2 = vpop.eup %1102  ;;  %v856_v61 = vmul.f32 %v1101_v45, %v1364_v7  ;;  %v857_v8 = vmul.f32 %v1101_v45, %v1367_v9  ;;  %v766_v10 = vsel %vm764_vm3, %v765_v6, %v763_v62 }
 0x26a   :  { %v824_v12 = vadd.f32 1e-07, %v766_v10  ;;  %v768_v18 = vmul.f32 %v1103_v2, %v1494_v15  ;;  %v1530_v19 = vpop.xlane.xlu1 %696 }
 0x26b   :  { %888 = vst [vmem:[#allocation5 + $0x40] sm:$0xff] %v856_v61  ;;  %889 = vst [vmem:[#allocation5 + $0x48] sm:$0xff] %v857_v8  ;;  %1116 = vrsqrt.f32 %v1530_v19  ;;  %vm797_vm12 = vcmp.eq.f32.partialorder %v1530_v19, inf  ;;  %v800_v45 = vand.u32 2147483648, %v1530_v19  ;;  %vm799_vm13 = vcmp.eq.f32.partialorder %v1530_v19, 0.0 }
 0x26c   :  { %v1105_v51 = vpop.eup %1104  ;;  %1118 = vrcp.f32 %v824_v12  ;;  %v770_v7 = vsel %vm769_vm4, %v1494_v15, %v768_v18 }
 0x26d   :  { %v1107_v9 = vpop.eup %1106  ;;  %v773_v22 = vsel %vm771_vm5, %v772_v3, %v770_v7  ;;  %v775_v25 = vmul.f32 %v1105_v51, %v1500_v32 }
 0x26e   :  { %v858_v42 = vmul.f32 %v1107_v9, %v1374_v14  ;;  %v859_v44 = vmul.f32 %v1107_v9, %v1377_v16  ;;  %v825_v26 = vadd.f32 1e-07, %v773_v22  ;;  %v1542_v34 = vpop.xlane.xlu0 %699 }
 0x26f   :  { %v777_v17 = vsel %vm776_vm6, %v1500_v32, %v775_v25  ;;  %1120 = vrsqrt.f32 %v1542_v34  ;;  %vm804_vm14 = vcmp.eq.f32.partialorder %v1542_v34, inf  ;;  %v807_v12 = vand.u32 2147483648, %v1542_v34 }
 0x270   :  { %v1109_v15 = vpop.eup %1108  ;;  %890 = vst [vmem:[#allocation5 + $0x50] sm:$0xff] %v858_v42  ;;  %891 = vst [vmem:[#allocation5 + $0x58] sm:$0xff] %v859_v44  ;;  %1122 = vrcp.f32 %v825_v26  ;;  %v780_v49 = vsel %vm778_vm7, %v779_v27, %v777_v17  ;;  %vm806_vm15 = vcmp.eq.f32.partialorder %v1542_v34, 0.0 }
 0x271   :  { %v1111_v52 = vpop.eup %1110  ;;  %v826_v14 = vadd.f32 1e-07, %v780_v49  ;;  %v782_v16 = vmul.f32 %v1109_v15, %v1510_v53 }
 0x272   :  { %v860_v36 = vmul.f32 %v1111_v52, %v1384_v21  ;;  %v861_v38 = vmul.f32 %v1111_v52, %v1387_v23  ;;  %v1552_v32 = vpop.xlane.xlu1 %702 }
 0x273   :  { %1124 = vrcp.f32 %v826_v14  ;;  %v784_v50 = vsel %vm783_vm8, %v1510_v53, %v782_v16  ;;  %vm811_vm0 = vcmp.eq.f32.partialorder %v1552_v32, inf  ;;  %v814_v22 = vand.u32 2147483648, %v1552_v32 }
 0x274   :  { %v1113_v46 = vpop.eup %1112  ;;  %892 = vst [vmem:[#allocation5 + $0x60] sm:$0xff] %v860_v36  ;;  %893 = vst [vmem:[#allocation5 + $0x68] sm:$0xff] %v861_v38  ;;  %v787_v54 = vsel %vm785_vm9, %v786_v39, %v784_v50  ;;  %1126 = vrsqrt.f32 %v1552_v32  ;;  %vm813_vm1 = vcmp.eq.f32.partialorder %v1552_v32, 0.0 }
 0x275   :  { %v1115_v21 = vpop.eup %1114  ;;  %v827_v29 = vadd.f32 1e-07, %v787_v54  ;;  %v789_v23 = vmul.f32 %v1113_v46, %v1520_v5 }
 0x276   :  { %v862_v57 = vmul.f32 %v1115_v21, %v1394_v28  ;;  %v863_v59 = vmul.f32 %v1115_v21, %v1397_v30 }
 0x277   :  { %1128 = vrcp.f32 %v827_v29  ;;  %v791_v53 = vsel %vm790_vm10, %v1520_v5, %v789_v23 }
 0x278   :  { %v1117_v60 = vpop.eup %1116  ;;  %894 = vst [vmem:[#allocation5 + $0x70] sm:$0xff] %v862_v57  ;;  %895 = vst [vmem:[#allocation5 + $0x78] sm:$0xff] %v863_v59  ;;  %v794_v41 = vsel %vm792_vm11, %v793_v56, %v791_v53 }
 0x279   :  { %v1119_v63 = vpop.eup %1118  ;;  %v828_v0 = vadd.f32 1e-07, %v794_v41  ;;  %v796_v6 = vmul.f32 %v1117_v60, %v1530_v19 }
 0x27a   :  { %v864_v28 = vmul.f32 %v1119_v63, %v1404_v35  ;;  %v865_v30 = vmul.f32 %v1119_v63, %v1407_v37 }
 0x27b   :  { %1130 = vrcp.f32 %v828_v0  ;;  %v798_v62 = vsel %vm797_vm12, %v1530_v19, %v796_v6 }
 0x27c   :  { %v1121_v5 = vpop.eup %1120  ;;  %896 = vst [vmem:[#allocation5 + $0x80] sm:$0xff] %v864_v28  ;;  %897 = vst [vmem:[#allocation5 + $0x88] sm:$0xff] %v865_v30  ;;  %v801_v2 = vsel %vm799_vm13, %v800_v45, %v798_v62 }
 0x27d   :  { %v1123_v61 = vpop.eup %1122  ;;  %v829_v8 = vadd.f32 1e-07, %v801_v2  ;;  %v803_v10 = vmul.f32 %v1121_v5, %v1542_v34 }
 0x27e   :  { %v866_v35 = vmul.f32 %v1123_v61, %v1414_v43  ;;  %v867_v37 = vmul.f32 %v1123_v61, %v1417_v47 }
 0x27f   :  { %1132 = vrcp.f32 %v829_v8  ;;  %v805_v18 = vsel %vm804_vm14, %v1542_v34, %v803_v10 }
 0x280   :  { %v1125_v19 = vpop.eup %1124  ;;  %898 = vst [vmem:[#allocation5 + $0x90] sm:$0xff] %v866_v35  ;;  %899 = vst [vmem:[#allocation5 + $0x98] sm:$0xff] %v867_v37  ;;  %v808_v3 = vsel %vm806_vm15, %v807_v12, %v805_v18 }
 0x281   :  { %v1127_v51 = vpop.eup %1126  ;;  %v868_v7 = vmul.f32 %v1125_v19, %v1424_v55  ;;  %v869_v43 = vmul.f32 %v1125_v19, %v1427_v58  ;;  %v830_v9 = vadd.f32 1e-07, %v808_v3 }
 0x282   :  { %v810_v47 = vmul.f32 %v1127_v51, %v1552_v32 }
 0x283   :  { %900 = vst [vmem:[#allocation5 + $0xa0] sm:$0xff] %v868_v7  ;;  %901 = vst [vmem:[#allocation5 + $0xa8] sm:$0xff] %v869_v43  ;;  %1134 = vrcp.f32 %v830_v9 }
 0x284   :  { %v1129_v25 = vpop.eup %1128  ;;  %v812_v42 = vsel %vm811_vm0, %v1552_v32, %v810_v47 }
 0x285   :  { %v870_v44 = vmul.f32 %v1129_v25, %v1434_v1  ;;  %v871_v55 = vmul.f32 %v1129_v25, %v1437_v4  ;;  %v815_v58 = vsel %vm813_vm1, %v814_v22, %v812_v42 }
 0x286   :  { %v831_v26 = vadd.f32 1e-07, %v815_v58 }
 0x287   :  { %902 = vst [vmem:[#allocation5 + $0xb0] sm:$0xff] %v870_v44  ;;  %903 = vst [vmem:[#allocation5 + $0xb8] sm:$0xff] %v871_v55 }
 0x288   :  { %v1131_v27 = vpop.eup %1130  ;;  %1136 = vrcp.f32 %v831_v26 }
 0x289   :  { %v872_v34 = vmul.f32 %v1131_v27, %v1444_v11  ;;  %v873_v17 = vmul.f32 %v1131_v27, %v1447_v13 }
 0x28b   :  { %904 = vst [vmem:[#allocation5 + $0xc0] sm:$0xff] %v872_v34  ;;  %905 = vst [vmem:[#allocation5 + $0xc8] sm:$0xff] %v873_v17 }
 0x28c   :  { %v1133_v15 = vpop.eup %1132 }
 0x28d   :  { %v874_v49 = vmul.f32 %v1133_v15, %v1454_v20  ;;  %v875_v52 = vmul.f32 %v1133_v15, %v1457_v24 }
 0x28f   :  { %906 = vst [vmem:[#allocation5 + $0xd0] sm:$0xff] %v874_v49  ;;  %907 = vst [vmem:[#allocation5 + $0xd8] sm:$0xff] %v875_v52 }
 0x290   :  { %v1135_v1 = vpop.eup %1134 }
 0x291   :  { %v876_v4 = vmul.f32 %v1135_v1, %v1464_v31  ;;  %v877_v14 = vmul.f32 %v1135_v1, %v1467_v33 }
 0x293   :  { %908 = vst [vmem:[#allocation5 + $0xe0] sm:$0xff] %v876_v4  ;;  %909 = vst [vmem:[#allocation5 + $0xe8] sm:$0xff] %v877_v14 }
 0x295   :  { %v1137_v11 = vpop.eup %1136 }
 0x296   :  { %v878_v13 = vmul.f32 %v1137_v11, %v1474_v40  ;;  %v879_v16 = vmul.f32 %v1137_v11, %v1477_v48 }
 0x298   :  { %910 = vst [vmem:[#allocation5 + $0xf0] sm:$0xff] %v878_v13  ;;  %911 = vst [vmem:[#allocation5 + $0xf8] sm:$0xff] %v879_v16 }
 0x299   :  { %1169 = shalt.err (!%p1166_p9)
}
 0x29a   :  { %s1187_s20 = smov 256   ;;  %s1188_s21 = smov 16  }
 0x29b   :  { %923 = dma.vmem_to_hbm [thread:$0]  %s918_s18, 4096, %s1603_s5, [#allocation4], %s1187_s20, %s1187_s20, %s1188_s21  }
 0x29c   :  { %1180 = dma.done.wait [#allocation4], 4096  }
 0x29d   :  { %1181 = vsyncadd [#allocation4], 4294963200 }
 0x29e   :  { %927 = vsyncpa [#allocation3], 1 }
 0x29f   :  { %928 = vsyncpa [#allocation4], 1 }

</bundles_post_ra>
